<compile_context>
chip_gen: v7x
topology: tpu7x:2x2x1
jax: 0.10.0
libtpu: 0.0.40
codegen_flags: <defaults>
</compile_context>

<pallas_src>
from functools import partial

import jax
import jax.numpy as jnp
from jax import lax
from jax.experimental import pallas as pl
from jax.experimental.pallas import tpu as pltpu


def _tv_kernel(x_ref, dx_ref, dy_ref, *, w):
    # x_ref:  VMEM block of shape (TB, H*W)  -- TB flattened (n, c) slices.
    # dx_ref: (1, 1, 1) per-block partial sum of |dx|
    # dy_ref: (1, 1, 1) per-block partial sum of |dy|
    x = x_ref[...].astype(jnp.float32)                 # (TB, H*W)

    # |dx|: neighbours one column apart == adjacent flat positions, excluding
    # pairs that straddle a row boundary (flat col % W == W-1).
    d1 = jnp.abs(x[:, 1:] - x[:, :-1])                 # (TB, H*W - 1)
    col = lax.broadcasted_iota(jnp.int32, d1.shape, 1) % w
    dx_sum = jnp.sum(jnp.where(col < w - 1, d1, 0.0))

    # |dy|: neighbours one row apart == flat positions W apart. Every such
    # pair is a valid (h, h+1) pair, so no mask is needed.
    dw = jnp.abs(x[:, w:] - x[:, :-w])                 # (TB, (H-1)*W)
    dy_sum = jnp.sum(dw)

    dx_ref[...] = dx_sum.reshape(1, 1, 1)
    dy_ref[...] = dy_sum.reshape(1, 1, 1)


def total_variation(x, *, target_block_bytes=1 << 20):
    """x: (N, C, H, W) array. Returns scalar f32: mean(|dx|) + mean(|dy|)."""
    N, C, H, W = x.shape
    NC, HW = N * C, H * W
    xf = x.reshape(NC, HW)

    # Fatten the block along N*C so each grid step moves ~1 MiB (>=85% of the
    # measured HBM roofline); keep the leading block dim a multiple of 8.
    itemsize = jnp.dtype(x.dtype).itemsize
    tb = max(1, target_block_bytes // (HW * 4))
    tb = min(tb, NC)
    tb = 8 * pl.cdiv(tb, 8)
    grid = pl.cdiv(NC, tb)
    pad = grid * tb - NC
    if pad:
        # Zero slices add exactly 0 to both partial sums.
        xf = jnp.pad(xf, ((0, pad), (0, 0)))

    cost = pl.CostEstimate(
        flops=6 * NC * HW,
        transcendentals=0,
        bytes_accessed=NC * HW * itemsize + 2 * grid * 4,
    )

    dx_part, dy_part = pl.pallas_call(
        partial(_tv_kernel, w=W),
        out_shape=(
            jax.ShapeDtypeStruct((grid, 1, 1), jnp.float32),
            jax.ShapeDtypeStruct((grid, 1, 1), jnp.float32),
        ),
        grid_spec=pltpu.PrefetchScalarGridSpec(
            num_scalar_prefetch=0,
            grid=(grid,),
            in_specs=[pl.BlockSpec((tb, HW), lambda i: (i, 0))],
            out_specs=(
                pl.BlockSpec((1, 1, 1), lambda i: (i, 0, 0)),
                pl.BlockSpec((1, 1, 1), lambda i: (i, 0, 0)),
            ),
        ),
        compiler_params=pltpu.CompilerParams(
            dimension_semantics=("parallel",),   # no cross-step state -> megacore OK
            vmem_limit_bytes=48 * 1024 * 1024,
        ),
        cost_estimate=cost,
    )(xf)

    n_dx = NC * H * (W - 1)
    n_dy = NC * (H - 1) * W
    return (jnp.sum(dx_part) / jnp.float32(n_dx)
            + jnp.sum(dy_part) / jnp.float32(n_dy))


if __name__ == "__main__":
    key = jax.random.PRNGKey(0)
    x = jax.random.normal(key, (2, 4, 16, 16), dtype=jnp.float32)

    out = jax.block_until_ready(total_variation(x))

    # Pure-JAX reference check.
    dx = jnp.abs(x[..., 1:] - x[..., :-1]).mean()
    dy = jnp.abs(x[..., 1:, :] - x[..., :-1, :]).mean()
    ref = dx + dy
    assert jnp.allclose(out, ref, rtol=1e-5, atol=1e-5), (out, ref)

    print("KERNEL_OK")
</pallas_src>

<mosaic_0001>
module attributes {stable_mosaic.version = 11 : i64} {
  func.func @_tv_kernel(%arg0: i32, %arg1: memref<8x256xf32, #tpu.memory_space<vmem>>, %arg2: memref<1x1x1xf32, #tpu.memory_space<vmem>>, %arg3: memref<1x1x1xf32, #tpu.memory_space<vmem>>) attributes {dimension_semantics = [#tpu.dimension_semantics<parallel>], iteration_bounds = array<i64: 1>, scalar_prefetch = 0 : i64, scratch_operands = 0 : i64, tpu.core_type = #tpu.core_type<tc>, window_params = [{transform_indices = @transform_0, window_bounds = array<i64: 8, 256>}, {transform_indices = @transform_1, window_bounds = array<i64: 1, 1, 1>}, {transform_indices = @transform_2, window_bounds = array<i64: 1, 1, 1>}]} {
    %c0 = arith.constant 0 : index
    %c0_0 = arith.constant 0 : index
    %0 = vector.load %arg1[%c0, %c0_0] : memref<8x256xf32, #tpu.memory_space<vmem>>, vector<8x256xf32>
    %1 = vector.extract_strided_slice %0 {offsets = [0, 1], sizes = [8, 255], strides = [1, 1]} : vector<8x256xf32> to vector<8x255xf32>
    %2 = vector.extract_strided_slice %0 {offsets = [0, 0], sizes = [8, 255], strides = [1, 1]} : vector<8x256xf32> to vector<8x255xf32>
    %3 = arith.subf %1, %2 : vector<8x255xf32>
    %4 = math.absf %3 : vector<8x255xf32>
    %5 = tpu.iota {dimensions = array<i32: 1>} : vector<8x255xi32>
    %c16_i32 = arith.constant 16 : i32
    %c0_i32 = arith.constant 0 : i32
    %6 = arith.cmpi eq, %c16_i32, %c0_i32 : i32
    %c1_i32 = arith.constant 1 : i32
    %7 = arith.select %6, %c1_i32, %c16_i32 : i32
    %8 = vector.broadcast %7 : i32 to vector<8x255xi32>
    %9 = arith.remsi %5, %8 : vector<8x255xi32>
    %c0_i32_1 = arith.constant 0 : i32
    %10 = vector.broadcast %c0_i32_1 : i32 to vector<8x255xi32>
    %11 = arith.cmpi ne, %9, %10 : vector<8x255xi32>
    %c0_i32_2 = arith.constant 0 : i32
    %12 = vector.broadcast %c0_i32_2 : i32 to vector<8x255xi32>
    %13 = arith.cmpi slt, %9, %12 : vector<8x255xi32>
    %c0_i32_3 = arith.constant 0 : i32
    %14 = arith.cmpi slt, %7, %c0_i32_3 : i32
    %15 = vector.broadcast %14 : i1 to vector<8x255xi1>
    %16 = vector.broadcast %15 : vector<8x255xi1> to vector<8x255xi1>
    %17 = arith.xori %13, %16 : vector<8x255xi1>
    %18 = arith.andi %17, %11 : vector<8x255xi1>
    %19 = vector.broadcast %7 : i32 to vector<8x255xi32>
    %20 = arith.addi %9, %19 : vector<8x255xi32>
    %21 = arith.select %18, %20, %9 : vector<8x255xi1>, vector<8x255xi32>
    %c15_i32 = arith.constant 15 : i32
    %22 = vector.broadcast %c15_i32 : i32 to vector<8x255xi32>
    %23 = arith.cmpi slt, %21, %22 : vector<8x255xi32>
    %cst = arith.constant 0.000000e+00 : f32
    %24 = vector.broadcast %cst : f32 to vector<8x255xf32>
    %25 = arith.select %23, %4, %24 : vector<8x255xi1>, vector<8x255xf32>
    %26 = vector.shape_cast %25 : vector<8x255xf32> to vector<1x8x255xf32>
    %cst_4 = arith.constant dense<0.000000e+00> : vector<1xf32>
    %27 = vector.multi_reduction <add>, %26, %cst_4 [1, 2] : vector<1x8x255xf32> to vector<1xf32>
    %28 = vector.shape_cast %27 : vector<1xf32> to vector<1x1x1xf32>
    %29 = vector.extract %28[0, 0, 0] : f32 from vector<1x1x1xf32>
    %30 = vector.extract_strided_slice %0 {offsets = [0, 16], sizes = [8, 240], strides = [1, 1]} : vector<8x256xf32> to vector<8x240xf32>
    %31 = vector.extract_strided_slice %0 {offsets = [0, 0], sizes = [8, 240], strides = [1, 1]} : vector<8x256xf32> to vector<8x240xf32>
    %32 = arith.subf %30, %31 : vector<8x240xf32>
    %33 = math.absf %32 : vector<8x240xf32>
    %34 = vector.shape_cast %33 : vector<8x240xf32> to vector<1x8x240xf32>
    %cst_5 = arith.constant dense<0.000000e+00> : vector<1xf32>
    %35 = vector.multi_reduction <add>, %34, %cst_5 [1, 2] : vector<1x8x240xf32> to vector<1xf32>
    %36 = vector.shape_cast %35 : vector<1xf32> to vector<1x1x1xf32>
    %37 = vector.extract %36[0, 0, 0] : f32 from vector<1x1x1xf32>
    %38 = vector.broadcast %29 : f32 to vector<1x1x1xf32>
    %c0_6 = arith.constant 0 : index
    %c0_7 = arith.constant 0 : index
    %c0_8 = arith.constant 0 : index
    %39 = vector.load %arg2[%c0_6, %c0_7, %c0_8] : memref<1x1x1xf32, #tpu.memory_space<vmem>>, vector<1x1x1xf32>
    tpu.vector_store %arg2[%c0_6, %c0_7, %c0_8], %38 {strides = array<i32>} : memref<1x1x1xf32, #tpu.memory_space<vmem>>, vector<1x1x1xf32>,
    %40 = vector.broadcast %37 : f32 to vector<1x1x1xf32>
    %c0_9 = arith.constant 0 : index
    %c0_10 = arith.constant 0 : index
    %c0_11 = arith.constant 0 : index
    %41 = vector.load %arg3[%c0_9, %c0_10, %c0_11] : memref<1x1x1xf32, #tpu.memory_space<vmem>>, vector<1x1x1xf32>
    tpu.vector_store %arg3[%c0_9, %c0_10, %c0_11], %40 {strides = array<i32>} : memref<1x1x1xf32, #tpu.memory_space<vmem>>, vector<1x1x1xf32>,
    return
  }
  func.func @transform_0(%arg0: i32) -> (i32, i32) {
    %c0_i32 = arith.constant 0 : i32
    %c0_i32_0 = arith.constant 0 : i32
    return %arg0, %c0_i32 : i32, i32
  }
  func.func @transform_1(%arg0: i32) -> (i32, i32, i32) {
    %c0_i32 = arith.constant 0 : i32
    %c0_i32_0 = arith.constant 0 : i32
    %c0_i32_1 = arith.constant 0 : i32
    return %arg0, %c0_i32, %c0_i32_0 : i32, i32, i32
  }
  func.func @transform_2(%arg0: i32) -> (i32, i32, i32) {
    %c0_i32 = arith.constant 0 : i32
    %c0_i32_0 = arith.constant 0 : i32
    %c0_i32_1 = arith.constant 0 : i32
    return %arg0, %c0_i32, %c0_i32_0 : i32, i32, i32
  }
}

</mosaic_0001>

<bundles_post_ra>
// kernel: tpu_custom_call.1
= control target key start
LH: loop header
LB: loop body
LE: loop exit
PB: predicated region body
PF: predicated region fallthrough
CT: control target
= control target key end

     0   :  { %8 = vsyncpa [#allocation3], 0  ;;  %s310_s0 = inlined_call_operand.hbm [shape: f32[8,256], index: 0, kind: input, shape index: {}]   ;;  %s311_s1 = inlined_call_operand.hbm [shape: f32[1,1,1], index: 1, kind: output, shape index: {0}]   ;;  %s312_s2 = inlined_call_operand.hbm [shape: f32[1,1,1], index: 2, kind: output, shape index: {1}]  }
   0x1   :  { %9 = vsyncpa [#allocation4], 0 }
   0x2   :  { %10 = vsyncpa [#allocation7], 0  ;;  %s242_s9 = smov [#allocation2]   ;;  %s170_s13 = scalar_lea.hbm %s310_s0, 256 }
   0x3   :  { %s17_s10 = sshll.u32 %s242_s9, 4  ;;  %p171_p0 = scmp.ne.s32.totalorder %s310_s0, %s170_s13  ;;  %s18_s10 = int_to_ptr.vmem [resolvable:$true] %s17_s10 }
   0x4   :  { %p174_p1 = scmp.lt.u32.totalorder %s170_s13, %s310_s0 }
   0x6   :  { %p176_p2 = pnand %p174_p1, %p171_p0 }
   0x8   :  { %179 = shalt.err (!%p176_p2)
}
   0x9   :  { %s180_s18 = scalar_lea.vmem %s18_s10, 256  ;;  %p185_p4 = scmp.lt.s32.totalorder %s18_s10, %s18_s10 }
   0xa   :  { %p181_p3 = scmp.ne.s32.totalorder %s18_s10, %s180_s18  ;;  %p186_p5 = scmp.lt.s32.totalorder %s180_s18, %s180_s18 }
   0xc   :  { %p187_p6 = por %p186_p5, %p185_p4 }
   0xe   :  { %p188_p7 = pnand %p187_p6, %p181_p3 }
  0x10   :  { %191 = shalt.err (!%p188_p7)
}
  0x11   :  { %20 = dma.hbm_to_vmem [thread:$0]  %s310_s0, 256, %s18_s10, [#allocation3]  }
  0x12   :  { %236 = dma.done.wait [#allocation3], 256  }
  0x13   :  { %237 = vsyncadd [#allocation3], 4294967040  ;;  %v24_v0 = vld [vmem:[#allocation2] sm:$0xff]  ;;  %s243_s21 = smov 16   ;;  %s244_s22 = smov 1   ;;  %v25_v1 = vld [vmem:[#allocation2 + $0x8] sm:$0xff]  ;;  %v40_v16 = vlaneseq }
  0x14   :  { %92 = vrot.lane.b32.xlu1 %v24_v0, %s243_s21  ;;  %28 = vrot.lane.b32.xlu0 %v24_v0, %s244_s22  ;;  %vm96_vm0 = vcmask 130048   ;;  %vm32_vm1 = vcmask 7168   ;;  %s245_s0 = smov 127   ;;  %s246_s23 = smov 112   ;;  %vm75_vm3 = vcmask 1039360   ;;  %vm110_vm5 = vcmask 916480  }
  0x15   :  { %v41_v17 = vand.u32 127, %v40_v16  ;;  %s247_s24 = smov [#allocation5]   ;;  %vm126_vm6 = vcmask 0   ;;  %s248_s27 = smov [#allocation6]  }
  0x16   :  { %s136_s25 = sshll.u32 %s247_s24, 4  ;;  %s146_s28 = sshll.u32 %s248_s27, 4  ;;  %s137_s25 = int_to_ptr.vmem [resolvable:$true] %s136_s25  ;;  %s277_s28 = int_to_ptr.vmem [resolvable:$true] %s146_s28 }
  0x17   :  { %v42_v18 = vadd.s32 128, %v41_v17  ;;  %v47_v20 = vand.u32 15, %v41_v17  ;;  %s192_s30 = scalar_lea.vmem %s137_s25, 16  ;;  %s196_s3 = scalar_lea.vmem %s137_s25, 32 }
  0x18   :  { %94 = vrot.lane.b32.xlu1 %v25_v1, %s243_s21  ;;  %30 = vrot.lane.b32.xlu0 %v25_v1, %s244_s22  ;;  %p193_p8 = scmp.ne.s32.totalorder %s137_s25, %s192_s30  ;;  %p197_p9 = scmp.lt.s32.totalorder %s137_s25, %s137_s25 }
  0x19   :  { %v54_v19 = vand.u32 15, %v42_v18  ;;  %vm67_vm4 = vcmp.lt.s32.totalorder %v47_v20, 15  ;;  %p198_p10 = scmp.lt.s32.totalorder %s196_s3, %s192_s30 }
  0x1b   :  { %vm68_vm2 = vcmp.lt.s32.totalorder %v54_v19, 15  ;;  %p199_p11 = por %p198_p10, %p197_p9 }
  0x1d   :  { %p200_p12 = pnand %p199_p11, %p193_p8 }
  0x86   :  { %v93_v2 = vpop.permute.xlu1 %92  ;;  %v29_v3 = vpop.permute.xlu0 %28 }
  0x87   :  { %v100_v4 = vsub.f32 %v24_v0, %v93_v2  ;;  %v36_v5 = vsub.f32 %v24_v0, %v29_v3 }
  0x89   :  { %v38_v6 = vand.u32 2147483647, %v36_v5  ;;  %v102_v9 = vand.u32 2147483647, %v100_v4 }
  0x8a   :  { %v95_v7 = vpop.permute.xlu1 %94  ;;  %v31_v8 = vpop.permute.xlu0 %30 }
  0x8b   :  { %v97_v10 = vsel %vm96_vm0, %v93_v2, %v95_v7  ;;  %v33_v11 = vsel %vm32_vm1, %v29_v3, %v31_v8  ;;  %71 = vrot.lane.b32.xlu0 %v38_v6, %s245_s0 }
  0x8c   :  { %v37_v12 = vsub.f32 %v25_v1, %v33_v11  ;;  %v101_v13 = vsub.f32 %v25_v1, %v97_v10 }
  0x8e   :  { %v39_v14 = vand.u32 2147483647, %v37_v12  ;;  %v103_v15 = vand.u32 2147483647, %v101_v13 }
  0x8f   :  { %106 = vrot.lane.b32.xlu0 %v102_v9, %s246_s23 }
  0x90   :  { %73 = vrot.lane.b32.xlu1 %v39_v14, %s245_s0 }
  0x94   :  { %108 = vrot.lane.b32.xlu1 %v103_v15, %s246_s23 }
  0xfd   :  { %v72_v21 = vpop.permute.xlu0 %71 }
 0x101   :  { %v107_v28 = vpop.permute.xlu0 %106 }
 0x102   :  { %v74_v22 = vpop.permute.xlu1 %73 }
 0x103   :  { %v76_v23 = vsel %vm75_vm3, %v72_v21, %v74_v22  ;;  %v80_v24 = vsel %vm68_vm2, %v74_v22, 0.0 }
 0x104   :  { %v79_v25 = vsel %vm67_vm4, %v76_v23, 0.0  ;;  %v81_v26 = vsel %vm75_vm3, %v80_v24, 0.0 }
 0x105   :  { %v82_v27 = vadd.f32 %v81_v26, %v79_v25 }
 0x106   :  { %v109_v29 = vpop.permute.xlu1 %108 }
 0x107   :  { %v111_v30 = vsel %vm110_vm5, %v107_v28, %v109_v29  ;;  %v114_v31 = vsel %vm110_vm5, %v109_v29, 0.0  ;;  %83 = vadd.xlane.f32.xlu0 %v82_v27 }
 0x108   :  { %v115_v32 = vadd.f32 %v114_v31, %v111_v30 }
 0x10a   :  { %116 = vadd.xlane.f32.xlu1 %v115_v32 }
 0x194   :  { %v84_v33 = vpop.xlane.xlu0 %83 }
 0x195   :  { %v85_v34 = vrot.slane %v84_v33, 4 }
 0x197   :  { %v86_v35 = vadd.f32 %v85_v34, %v84_v33  ;;  %v117_v36 = vpop.xlane.xlu1 %116 }
 0x198   :  { %v118_v37 = vrot.slane %v117_v36, 4 }
 0x199   :  { %v87_v38 = vrot.slane %v86_v35, 2 }
 0x19a   :  { %v119_v39 = vadd.f32 %v118_v37, %v117_v36 }
 0x19b   :  { %v88_v40 = vadd.f32 %v87_v38, %v86_v35 }
 0x19c   :  { %v120_v41 = vrot.slane %v119_v39, 2 }
 0x19d   :  { %v89_v42 = vrot.slane %v88_v40, 1 }
 0x19e   :  { %v121_v43 = vadd.f32 %v120_v41, %v119_v39 }
 0x19f   :  { %v90_v44 = vadd.f32 %v89_v42, %v88_v40 }
 0x1a0   :  { %v122_v45 = vrot.slane %v121_v43, 1 }
 0x1a1   :  { %159 = vpush %v90_v44 }
 0x1a2   :  { %v123_v46 = vadd.f32 %v122_v45, %v121_v43 }
 0x1a4   :  { %161 = vpush %v123_v46 }
 0x1d2   :  { %s160_s26 = spop %159 }
 0x1d3   :  { %v125_v47 = vstv %s160_s26 }
 0x1d4   :  { %127 = vst.msk [vmem:[#allocation5] sm:$0x1] %vm126_vm6, %v125_v47 }
 0x1d5   :  { %s162_s29 = spop %161 }
 0x1d6   :  { %v128_v48 = vstv %s162_s29 }
 0x1d7   :  { %203 = shalt.err (!%p200_p12)
}
 0x1d8   :  { %s204_s6 = scalar_lea.hbm %s311_s1, 16 }
 0x1d9   :  { %p205_p13 = scmp.ne.s32.totalorder %s311_s1, %s204_s6  ;;  %p208_p0 = scmp.lt.u32.totalorder %s204_s6, %s311_s1 }
 0x1db   :  { %p210_p1 = pnand %p208_p0, %p205_p13 }
 0x1dd   :  { %213 = shalt.err (!%p210_p1)
}
 0x1de   :  { %139 = dma.vmem_to_hbm [thread:$0]  %s137_s25, 16, %s311_s1, [#allocation4]   ;;  %129 = vst.msk [vmem:[#allocation6] sm:$0x1] %vm126_vm6, %v128_v48 }
 0x1df   :  { %s214_s13 = scalar_lea.vmem %s277_s28, 16  ;;  %s218_s14 = scalar_lea.vmem %s277_s28, 32 }
 0x1e0   :  { %p215_p2 = scmp.ne.s32.totalorder %s277_s28, %s214_s13  ;;  %p219_p3 = scmp.lt.s32.totalorder %s277_s28, %s277_s28 }
 0x1e1   :  { %p220_p4 = scmp.lt.s32.totalorder %s218_s14, %s214_s13 }
 0x1e3   :  { %p221_p5 = por %p220_p4, %p219_p3 }
 0x1e5   :  { %p222_p6 = pnand %p221_p5, %p215_p2 }
 0x1e7   :  { %225 = shalt.err (!%p222_p6)
}
 0x1e8   :  { %s226_s17 = scalar_lea.hbm %s312_s2, 16 }
 0x1e9   :  { %p227_p7 = scmp.ne.s32.totalorder %s312_s2, %s226_s17  ;;  %p230_p8 = scmp.lt.u32.totalorder %s226_s17, %s312_s2 }
 0x1eb   :  { %p232_p9 = pnand %p230_p8, %p227_p7 }
 0x1ed   :  { %235 = shalt.err (!%p232_p9)
}
 0x1ee   :  { %149 = dma.vmem_to_hbm [thread:$0]  %s277_s28, 16, %s312_s2, [#allocation7]  }
 0x1ef   :  { %238 = dma.done.wait [#allocation4], 16  }
 0x1f0   :  { %239 = vsyncadd [#allocation4], 4294967280 }
 0x1f1   :  { %240 = dma.done.wait [#allocation7], 16  }
 0x1f2   :  { %241 = vsyncadd [#allocation7], 4294967280 }
 0x1f3   :  { %156 = vsyncpa [#allocation3], 1 }
 0x1f4   :  { %157 = vsyncpa [#allocation4], 1 }
 0x1f5   :  { %158 = vsyncpa [#allocation7], 1 }

</bundles_post_ra>
